<compile_context>
chip_gen: v7x
topology: tpu7x:2x2x1
jax: 0.10.0
libtpu: 0.0.40
codegen_flags: <defaults>
</compile_context>

<pallas_src>
import functools

import jax
import jax.numpy as jnp
from jax.experimental import pallas as pl
from jax.experimental.pallas import tpu as pltpu

D_IN = 128
D_HID = 256
D_OUT = 128


def _round_up(n, m):
    return ((n + m - 1) // m) * m


def mlp_kernel(x_ref, w1_ref, w2_ref, o_ref):
    # x_ref: (TM, 128) f32   w1_ref: (128, 256) bf16   w2_ref: (256, 128) bf16
    # o_ref: (TM, 128) out_dtype
    x = x_ref[...].astype(w1_ref.dtype)                       # cast on VPU, hidden under DMA
    h = jnp.dot(x, w1_ref[...],
                preferred_element_type=jnp.float32)           # MXU, f32 acc
    h = jnp.maximum(h, 0.0)                                   # ReLU on the VPU
    out = jnp.dot(h.astype(w2_ref.dtype), w2_ref[...],
                  preferred_element_type=jnp.float32)         # MXU, f32 acc
    o_ref[...] = out.astype(o_ref.dtype)


@functools.partial(jax.jit, static_argnames=("block_m", "out_dtype"))
def toy_model_forward(x, w1_t, w2_t, *, block_m=4096, out_dtype=None):
    """x: [B, 128], w1_t: [128, 256], w2_t: [256, 128] -> [B, 128]."""
    out_dtype = x.dtype if out_dtype is None else out_dtype
    compute_dtype = jnp.bfloat16
    B = x.shape[0]

    # Weights: no-op if caller already passes bf16 (recommended).
    w1c = w1_t if w1_t.dtype == compute_dtype else w1_t.astype(compute_dtype)
    w2c = w2_t if w2_t.dtype == compute_dtype else w2_t.astype(compute_dtype)

    # Batch tile: as large as block_m allows, 16-row aligned, but capped at
    # ~B/2 (when the batch is big enough) so the grid keeps >= 2 steps and
    # v7x's two TensorCores both get work.
    if B >= 32:
        tm_cap = _round_up(pl.cdiv(B, 2), 16)
    else:
        tm_cap = _round_up(B, 8)
    tm = max(8, min(block_m, tm_cap))
    grid = (pl.cdiv(B, tm),)

    cost = pl.CostEstimate(
        flops=2 * B * (D_IN * D_HID + D_HID * D_OUT),
        transcendentals=0,
        bytes_accessed=(B * D_IN * x.dtype.itemsize
                        + D_IN * D_HID * 2 + D_HID * D_OUT * 2
                        + B * D_OUT * jnp.dtype(out_dtype).itemsize),
    )

    out = pl.pallas_call(
        mlp_kernel,
        out_shape=jax.ShapeDtypeStruct((B, D_OUT), out_dtype),
        grid=grid,
        in_specs=[
            # Streamed batch tile: new block each grid step (double-buffered).
            pl.BlockSpec((tm, D_IN), lambda i: (i, 0)),
            # Weights: same block every step -> stay resident in VMEM.
            pl.BlockSpec((D_IN, D_HID), lambda i: (0, 0)),
            pl.BlockSpec((D_HID, D_OUT), lambda i: (0, 0)),
        ],
        out_specs=pl.BlockSpec((tm, D_OUT), lambda i: (i, 0)),
        compiler_params=pltpu.CompilerParams(
            dimension_semantics=("parallel",),
            vmem_limit_bytes=32 * 1024 * 1024),
        cost_estimate=cost,
    )(x, w1c, w2c)

    return out


def reference_forward(x, w1_t, w2_t, out_dtype=None):
    # Same numerics as the kernel: bf16 operands, f32 accumulation.
    out_dtype = x.dtype if out_dtype is None else out_dtype
    xc = x.astype(jnp.bfloat16)
    h = jnp.dot(xc, w1_t.astype(jnp.bfloat16),
                preferred_element_type=jnp.float32)
    h = jnp.maximum(h, 0.0)
    out = jnp.dot(h.astype(jnp.bfloat16), w2_t.astype(jnp.bfloat16),
                  preferred_element_type=jnp.float32)
    return out.astype(out_dtype)


if __name__ == "__main__":
    key = jax.random.PRNGKey(0)
    kx, k1, k2 = jax.random.split(key, 3)

    # Small batch, non-multiple of the tile -> exercises the masked partial
    # last block (tm = 160, grid = 2).
    B = 300

    x = jax.random.normal(kx, (B, D_IN), dtype=jnp.float32)

    # Deterministic param init (Kaiming-uniform-like scale, like nn.Linear).
    # PyTorch weights: linear1.weight [256,128], linear2.weight [128,256].
    bound1 = 1.0 / (D_IN ** 0.5)
    bound2 = 1.0 / (D_HID ** 0.5)
    w1 = jax.random.uniform(k1, (D_HID, D_IN), jnp.float32, -bound1, bound1)
    w2 = jax.random.uniform(k2, (D_OUT, D_HID), jnp.float32, -bound2, bound2)
    # Kernel layout: [in, out]; pre-cast to bf16 once (no per-call cast op).
    w1_t = w1.T.astype(jnp.bfloat16)
    w2_t = w2.T.astype(jnp.bfloat16)

    out = toy_model_forward(x, w1_t, w2_t)
    out = jax.block_until_ready(out)

    ref = reference_forward(x, w1_t, w2_t)
    assert out.shape == (B, D_OUT)
    assert out.dtype == x.dtype
    assert jnp.allclose(out, ref, atol=2e-2, rtol=2e-2), (
        float(jnp.max(jnp.abs(out - ref))))

    print("KERNEL_OK")
</pallas_src>

<mosaic_0001>
module attributes {stable_mosaic.version = 11 : i64} {
  func.func @mlp_kernel(%arg0: i32, %arg1: memref<160x128xf32, #tpu.memory_space<vmem>>, %arg2: memref<128x256xbf16, #tpu.memory_space<vmem>>, %arg3: memref<256x128xbf16, #tpu.memory_space<vmem>>, %arg4: memref<160x128xf32, #tpu.memory_space<vmem>>) attributes {dimension_semantics = [#tpu.dimension_semantics<parallel>], iteration_bounds = array<i64: 2>, scalar_prefetch = 0 : i64, scratch_operands = 0 : i64, tpu.core_type = #tpu.core_type<tc>, window_params = [{transform_indices = @transform_0, window_bounds = array<i64: 160, 128>}, {pipeline_mode = #tpu.pipeline_mode<synchronous>, transform_indices = @transform_1, window_bounds = array<i64: 128, 256>}, {pipeline_mode = #tpu.pipeline_mode<synchronous>, transform_indices = @transform_2, window_bounds = array<i64: 256, 128>}, {transform_indices = @transform_3, window_bounds = array<i64: 160, 128>}]} {
    %c0 = arith.constant 0 : index
    %c0_0 = arith.constant 0 : index
    %0 = vector.load %arg1[%c0, %c0_0] : memref<160x128xf32, #tpu.memory_space<vmem>>, vector<160x128xf32>
    %1 = arith.truncf %0 : vector<160x128xf32> to vector<160x128xbf16>
    %c0_1 = arith.constant 0 : index
    %c0_2 = arith.constant 0 : index
    %2 = vector.load %arg2[%c0_1, %c0_2] : memref<128x256xbf16, #tpu.memory_space<vmem>>, vector<128x256xbf16>
    %cst = arith.constant dense<0.000000e+00> : vector<160x256xf32>
    %3 = tpu.matmul %1, %2, %cst {dimension_numbers = #tpu.dot_dimension_numbers<[1], [0], [0], [1], [0, 0, 1, 1], [], []>} : vector<160x128xbf16>, vector<128x256xbf16>, vector<160x256xf32> -> vector<160x256xf32>
    %cst_3 = arith.constant 0.000000e+00 : f32
    %4 = vector.broadcast %cst_3 : f32 to vector<160x256xf32>
    %5 = arith.maximumf %3, %4 : vector<160x256xf32>
    %6 = arith.truncf %5 : vector<160x256xf32> to vector<160x256xbf16>
    %c0_4 = arith.constant 0 : index
    %c0_5 = arith.constant 0 : index
    %7 = vector.load %arg3[%c0_4, %c0_5] : memref<256x128xbf16, #tpu.memory_space<vmem>>, vector<256x128xbf16>
    %cst_6 = arith.constant dense<0.000000e+00> : vector<160x128xf32>
    %8 = tpu.matmul %6, %7, %cst_6 {dimension_numbers = #tpu.dot_dimension_numbers<[1], [0], [0], [1], [0, 0, 1, 1], [], []>} : vector<160x256xbf16>, vector<256x128xbf16>, vector<160x128xf32> -> vector<160x128xf32>
    %c0_7 = arith.constant 0 : index
    %c0_8 = arith.constant 0 : index
    %9 = vector.load %arg4[%c0_7, %c0_8] : memref<160x128xf32, #tpu.memory_space<vmem>>, vector<160x128xf32>
    tpu.vector_store %arg4[%c0_7, %c0_8], %8 {strides = array<i32>} : memref<160x128xf32, #tpu.memory_space<vmem>>, vector<160x128xf32>,
    return
  }
  func.func @transform_0(%arg0: i32) -> (i32, i32) {
    %c0_i32 = arith.constant 0 : i32
    %c0_i32_0 = arith.constant 0 : i32
    return %arg0, %c0_i32 : i32, i32
  }
  func.func @transform_1(%arg0: i32) -> (i32, i32) {
    %c0_i32 = arith.constant 0 : i32
    %c0_i32_0 = arith.constant 0 : i32
    %c0_i32_1 = arith.constant 0 : i32
    return %c0_i32, %c0_i32_0 : i32, i32
  }
  func.func @transform_2(%arg0: i32) -> (i32, i32) {
    %c0_i32 = arith.constant 0 : i32
    %c0_i32_0 = arith.constant 0 : i32
    %c0_i32_1 = arith.constant 0 : i32
    return %c0_i32, %c0_i32_0 : i32, i32
  }
  func.func @transform_3(%arg0: i32) -> (i32, i32) {
    %c0_i32 = arith.constant 0 : i32
    %c0_i32_0 = arith.constant 0 : i32
    return %arg0, %c0_i32 : i32, i32
  }
}

</mosaic_0001>

<bundles_post_ra>
// kernel: toy_model_forward.1
= control target key start
LH: loop header
LB: loop body
LE: loop exit
PB: predicated region body
PF: predicated region fallthrough
CT: control target
= control target key end

     0   :  { %8 = vsyncpa [#allocation3], 0  ;;  %s1661_s0 = inlined_call_operand.hbm [shape: f32[300,128], index: 0, kind: input, shape index: {}]   ;;  %s1662_s1 = inlined_call_operand.hbm [shape: bf16[128,256], index: 1, kind: input, shape index: {}]   ;;  %s1663_s2 = inlined_call_operand.hbm [shape: bf16[256,128], index: 2, kind: input, shape index: {}]   ;;  %s1664_s3 = inlined_call_operand.hbm [shape: f32[300,128], index: 3, kind: output, shape index: {}]  }
   0x1   :  { %10 = vsyncpa [#allocation3 + $0x1], 0 }
   0x2   :  { %11 = vsyncpa [#allocation6], 0 }
   0x3   :  { %12 = vsyncpa [#allocation4], 0 }
   0x4   :  { %14 = vsyncpa [#allocation4 + $0x1], 0  ;;  %s1357_s12 = smov 0   ;;  %s1359_s13 = smov 0  }
   0x5   :  { %s1361_s14 = smov 0   ;;  %s1363_s15 = smov 0  }
   0x6 LB: > { %s1378_s16 = sadd.s32 4294967295, %s1322_s15   ;;  %s927_s17 = sadd.s32 4294967294, %s1322_s15   ;;  %s1322_s15 = sphi %s1363_s15, %s1684_s15   ;;  %s1318_s14 = sphi %s1361_s14, %s1683_s14   ;;  %s1314_s13 = sphi %s1359_s13, %s1682_s13   ;;  %s1310_s12 = sphi %s1357_s12, %s1681_s12  }
   0x7   : > { %s1382_s18 = sadd.s32 1, %s1322_s15   ;;  %s27_s19 = sadd.s32 1, %s1318_s14 }
   0x8   : > { %s24_s20 = ssub.s32 %s1322_s15, %s1382_s18  ;;  %p34_p0 = scmp.ne.s32.totalorder %s1318_s14, %s1314_s13 }
   0x9   : > { %p25_p1 = scmp.eq.s32.totalorder %s24_s20, 0  ;;  %p35_p2 = scmp.eq.s32.totalorder %s1322_s15, 0 }
   0xa   : > { %p40_p3 = scmp.ne.s32.totalorder %s1314_s13, %s1310_s12  ;;  %p1665_p4 = scmp.eq.s32.totalorder %s1378_s16, 0 }
   0xb   : > { %s1394_s21 = scalar_select %p25_p1, %s1318_s14, %s27_s19  }
   0xc   : > { %p1396_p5 = por %p35_p2, %p34_p0  ;;  %p1402_p6 = por %p1665_p4, %p40_p3 }
   0xd   : > { %p106_p7 = scmp.eq.s32.totalorder %s1378_s16, 1  ;;  %p112_p8 = scmp.eq.s32.totalorder %s927_s17, 1 }
   0xe   : > { %s1668_s22 = scalar_select %p1396_p5, 1, 0 }
   0xf   : > { %s1669_s23 = scalar_select %p1402_p6, 1, 0 }
  0x10   : > { %p928_p9 = scmp.ge.s32.totalorder %s1322_s15, 1  ;;  %p119_p10 = scmp.lt.s32.totalorder %s1322_s15, 3 }
  0x11   : > { %p1409_p11 = por %p106_p7, %p34_p0  ;;  %p1413_p12 = por %p112_p8, %p40_p3 }
  0x12   : > { %p1417_p13 = pnand %p928_p9, %p119_p10  ;;  %s1324_s27 = smov [#allocation5]  }
  0x13   : > { %s1670_s24 = scalar_select %p1409_p11, 1, 0 }
  0x14   : > { %s1671_s25 = scalar_select %p1413_p12, 1, 0 }
  0x15   : > { %s1672_s26 = scalar_select %p1417_p13, 1, 0 }
  0x16   : > { %p1069_p1 = pneg %p1417_p13  ;;  %s131_s28 = sshll.u32 %s1324_s27, 4  ;;  %s132_s28 = int_to_ptr.vmem [resolvable:$true] %s131_s28 }
  0x17   : > { %s1325_s30 = smov [#allocation7]   ;;  %s1168_s7 = scalar_lea.hbm %s1662_s1, 2048 }
  0x18   : > { %p1425_p2 = pnand %p1069_p1, %p1665_p4  ;;  %s144_s4 = sshll.u32 %s1325_s30, 4  ;;  %s1429_s4 = int_to_ptr.vmem [resolvable:$true] %s144_s4 }
  0x19   : > { %p1169_p0 = scmp.ne.s32.totalorder %s1662_s1, %s1168_s7  ;;  %p1175_p9 = scmp.lt.u32.totalorder %s1168_s7, %s1662_s1 }
  0x1a   : > { %p1170_p3 = pneg %p1425_p2 }
  0x1c   : > { %p1171_p7 = pnand %p1170_p3, %p1169_p0 }
  0x1e   : > { %p1172_p8 = pneg %p1171_p7 }
  0x20   : > { %p1177_p10 = pnand %p1175_p9, %p1172_p8 }
  0x22   : > { %1180 = shalt.err (!%p1177_p10)
}
  0x23   : > { %s1181_s17 = scalar_lea.vmem %s132_s28, 2048  ;;  %p1189_p11 = scmp.lt.s32.totalorder %s132_s28, %s132_s28 }
  0x24   : > { %p1182_p1 = scmp.ne.s32.totalorder %s132_s28, %s1181_s17  ;;  %p1190_p6 = scmp.lt.s32.totalorder %s1181_s17, %s1181_s17 }
  0x26   : > { %p1184_p4 = pnand %p1182_p1, %p1170_p3  ;;  %p1191_p13 = por %p1190_p6, %p1189_p11 }
  0x28   : > { %p1185_p12 = pneg %p1184_p4 }
  0x2a   : > { %p1192_p5 = pnand %p1191_p13, %p1185_p12 }
  0x2c   : > { %1195 = shalt.err (!%p1192_p5)
}
  0x2d   : > { %s1326_s19 = smov 128   ;;  %s1327_s20 = smov 8  }
  0x2e   : > { %1072 = dma.hbm_to_vmem [thread:$0]  (!%p1425_p2), %s1662_s1, 2048, %s132_s28, [#allocation6], %s1326_s19, %s1326_s19, %s1327_s20  }
  0x2f   : > { %s1196_s7 = scalar_lea.hbm %s1663_s2, 2048 }
  0x30   : > { %p1197_p4 = scmp.ne.s32.totalorder %s1663_s2, %s1196_s7  ;;  %p1203_p11 = scmp.lt.u32.totalorder %s1196_s7, %s1663_s2 }
  0x32   : > { %p1199_p5 = pnand %p1197_p4, %p1170_p3 }
  0x34   : > { %p1200_p6 = pneg %p1199_p5 }
  0x36   : > { %p1205_p12 = pnand %p1203_p11, %p1200_p6 }
  0x38   : > { %1208 = shalt.err (!%p1205_p12)
}
  0x39   : > { %s1209_s28 = scalar_lea.vmem %s1429_s4, 2048  ;;  %p1217_p8 = scmp.lt.s32.totalorder %s1429_s4, %s1429_s4 }
  0x3a   : > { %p1210_p13 = scmp.ne.s32.totalorder %s1429_s4, %s1209_s28  ;;  %p1218_p9 = scmp.lt.s32.totalorder %s1209_s28, %s1209_s28 }
  0x3c   : > { %p1212_p0 = pnand %p1210_p13, %p1170_p3  ;;  %p1219_p10 = por %p1218_p9, %p1217_p8 }
  0x3e   : > { %p1213_p7 = pneg %p1212_p0 }
  0x40   : > { %p1220_p1 = pnand %p1219_p10, %p1213_p7 }
  0x42   : > { %1223 = shalt.err (!%p1220_p1)
}
  0x43   : > { %s1328_s17 = smov 64   ;;  %s1329_s19 = smov 4  }
  0x44   : > { %1075 = dma.hbm_to_vmem [thread:$0]  (!%p1425_p2), %s1663_s2, 2048, %s1429_s4, [#allocation6], %s1328_s17, %s1328_s17, %s1329_s19  }
  0x45   : > { %p931_p4 = scmp.ge.s32.totalorder %s1322_s15, 2 }
  0x46   : > { %p1674_p3 = scmp.ne.s32.totalorder (!%p931_p4), %s1668_s22, 0 }
  0x47   : > { %154 = sbr.rel (%p931_p4) target bundleno = 113 (0x71), region = 24 }
  0x4e   : > { %157 = sbr.rel (!%p1674_p3) target bundleno = 113 (0x71), region = 28  ;;  %s158_s30 = sand.u32 (%p1674_p3), 1, %s1318_s14  }
  0x4f   : > { %s163_s5 = smul.u32 (%p1674_p3), 20, %s1322_s15  ;;  %s1488_s8 = scalar_lea.sflag (%p1674_p3), [#allocation3], %s158_s30 }
  0x50   : > { %s1057_s6 = smul.u32 (%p1674_p3), 160, %s158_s30 }
  0x51   : > { %s164_s7 = ssub.s32 (%p1674_p3), 38, %s163_s5 }
  0x52   : > { %p165_p5 = scmp.lt.s32.totalorder (%p1674_p3), %s164_s7, 20  ;;  %s162_s9 = scalar_lea.vmem (%p1674_p3), [#allocation2], %s1057_s6 }
  0x55   : > { %s1686_s7 = smov (!%p165_p5, %s164_s7), 20 }
  0x56   : > { %s1485_s29 = sshll.u32 %s1686_s7, 7 }
  0x57   : > { %s169_s4 = ssub.s32 2560, %s1485_s29 }
  0x58   : > { %170 = vsyncadd %s1488_s8, %s169_s4  ;;  %p933_p2 = scmp.ne.s32.totalorder %s1485_s29, 0  ;;  %s979_s22 = smul.u32 2560, %s1322_s15 }
  0x59   : > { %s175_s10 = sshll.u32 %s162_s9, 4  ;;  %s1228_s30 = scalar_lea.hbm %s1661_s0, 4864  ;;  %s1498_s10 = int_to_ptr.vmem [resolvable:$true] %s175_s10 }
  0x5a   : > { %s1496_s17 = scalar_lea.hbm %s1661_s0, %s979_s22 }
  0x5b   : > { %s1224_s19 = scalar_lea.hbm %s1496_s17, %s1485_s29  ;;  %p1229_p13 = scmp.lt.u32.totalorder %s1496_s17, %s1661_s0 }
  0x5c   : > { %p1225_p6 = scmp.ne.s32.totalorder %s1496_s17, %s1224_s19  ;;  %p1230_p0 = scmp.lt.u32.totalorder %s1228_s30, %s1224_s19 }
  0x5d   : > { %p1232_p8 = scmp.lt.u32.totalorder %s1224_s19, %s1496_s17 }
  0x5e   : > { %p1226_p11 = pnand %p1225_p6, %p933_p2  ;;  %p1231_p7 = por %p1230_p0, %p1229_p13 }
  0x60   : > { %p1227_p12 = pneg %p1226_p11  ;;  %p1233_p9 = por %p1232_p8, %p1231_p7 }
  0x62   : > { %p1234_p10 = pnand %p1233_p9, %p1227_p12 }
  0x64   : > { %1237 = shalt.err (!%p1234_p10)
}
  0x65   : > { %s1238_s7 = scalar_lea.vmem %s1498_s10, %s1485_s29  ;;  %s1330_s4 = smov [#allocation2]  }
  0x66   : > { %p1239_p1 = scmp.ne.s32.totalorder %s1498_s10, %s1238_s7  ;;  %s1242_s9 = sshll.u32 %s1330_s4, 4  ;;  %s1243_s9 = int_to_ptr.vmem [resolvable:$false] %s1242_s9 }
  0x67   : > { %s1244_s22 = scalar_lea.vmem %s1243_s9, 5120  ;;  %p1245_p6 = scmp.lt.s32.totalorder %s1498_s10, %s1243_s9 }
  0x68   : > { %p1240_p3 = pnand %p1239_p1, %p933_p2  ;;  %p1246_p11 = scmp.lt.s32.totalorder %s1244_s22, %s1238_s7 }
  0x6a   : > { %p1241_p5 = pneg %p1240_p3  ;;  %p1247_p13 = por %p1246_p11, %p1245_p6 }
  0x6c   : > { %p1248_p0 = pnand %p1247_p13, %p1241_p5 }
  0x6e   : > { %1251 = shalt.err (!%p1248_p0)
}
  0x6f   : > { %s1331_s11 = smov 128   ;;  %s1332_s28 = smov 8  }
  0x70   : > { %181 = dma.hbm_to_vmem [thread:$0]  (%p933_p2), %s1496_s17, %s1485_s29, %s1498_s10, %s1488_s8, %s1331_s11, %s1331_s11, %s1332_s28  }
  0x71 PF: > { %p1675_p12 = scmp.ne.s32.totalorder %s1672_s26, 0 }
  0x72   : > { %s1528_s19 = sand.u32 (!%p1675_p12), 1, %s1314_s13   ;;  %p1676_p7 = scmp.ne.s32.totalorder (!%p1675_p12), %s1669_s23, 0 }
  0x73   : > { %187 = sbr.rel (%p1675_p12) target bundleno = 697 (0x2b9), region = 32  ;;  %s190_s27 = scalar_lea.sflag (!%p1675_p12), [#allocation3], %s1528_s19 }
  0x74   : > { %s1058_s20 = smul.u32 (!%p1675_p12), 160, %s1528_s19 }
  0x76   : > { %s1534_s30 = scalar_lea.vmem (!%p1675_p12), [#allocation2], %s1058_s20 }
  0x7a   : > { %1297 = dma.done.wait (%p1676_p7), %s190_s27, 2560  }
  0x7b   : > { %1299 = vsyncadd (%p1676_p7), %s190_s27, 4294964736  ;;  %p1677_p2 = scmp.eq.s32.totalorder %s1378_s16, 0 }
  0x7d   : > { %1301 = dma.done.wait (%p1677_p2), [#allocation6], 4096   ;;  %p1678_p8 = pmov %p1677_p2 }
  0x7e   : > { %v1333_v0 = vmov 0   ;;  %v1128_v1 = vld [vmem:[#allocation5 + $0x4] ss:$8 sps:$4 sm:$0xff]   ;;  %v1130_v2 = vld [vmem:[#allocation5] ss:$8 sps:$4 sm:$0xff]   ;;  %v1156_v18 = vld [vmem:[#allocation7 + $0x50] sm:$0xff]  }
  0x7f   : > { %1303 = vsyncadd (%p1678_p8), [#allocation6], 4294963200  ;;  %393 = vmatprep.mubr.bf16.mxu0 %v1333_v0  ;;  %361 = vmatprep.subr.bf16.mxu0 %v1128_v1  ;;  %v1131_v3 = vld [vmem:[#allocation5 + $0x14] ss:$8 sps:$4 sm:$0xff]   ;;  %v1133_v4 = vld [vmem:[#allocation5 + $0x10] ss:$8 sps:$4 sm:$0xff]  }
  0x80   : > { %362 = vmatpush1.bf16.msra.mxu0 %v1130_v2  ;;  %v1134_v5 = vld [vmem:[#allocation5 + $0x24] ss:$8 sps:$4 sm:$0xff]   ;;  %v1136_v6 = vld [vmem:[#allocation5 + $0x20] ss:$8 sps:$4 sm:$0xff]   ;;  %v1137_v7 = vld [vmem:[#allocation5 + $0x34] ss:$8 sps:$4 sm:$0xff]  }
  0x81   : > { %363 = vmatprep.subr.bf16.mxu0 %v1131_v3  ;;  %v1139_v8 = vld [vmem:[#allocation5 + $0x30] ss:$8 sps:$4 sm:$0xff]   ;;  %v1140_v9 = vld [vmem:[#allocation5 + $0x44] ss:$8 sps:$4 sm:$0xff]   ;;  %v1142_v10 = vld [vmem:[#allocation5 + $0x40] ss:$8 sps:$4 sm:$0xff]  }
  0x82   : > { %v1143_v11 = vld [vmem:[#allocation5 + $0x54] ss:$8 sps:$4 sm:$0xff]   ;;  %v1145_v12 = vld [vmem:[#allocation5 + $0x50] ss:$8 sps:$4 sm:$0xff]   ;;  %v1146_v13 = vld [vmem:[#allocation5 + $0x64] ss:$8 sps:$4 sm:$0xff]  }
  0x83   : > { %v1152_v14 = vld [vmem:[#allocation7 + $0x40] sm:$0xff]   ;;  %v1154_v16 = vld [vmem:[#allocation7 + $0x48] sm:$0xff]   ;;  %v1149_v20 = vld [vmem:[#allocation5 + $0x74] ss:$8 sps:$4 sm:$0xff]   ;;  %s1576_s23 = scalar_lea.vmem [#allocation8], %s1058_s20  ;;  %s816_s26 = scalar_lea.sflag [#allocation4], %s1528_s19 }
  0x84   : > { %364 = vmatpush1.bf16.msra.mxu0 %v1133_v4  ;;  %v1153_v15 = vld [vmem:[#allocation7] sm:$0xff]   ;;  %981 = vmatprep.subr.bf16.mxu1 %v1152_v14  ;;  %v1155_v17 = vld [vmem:[#allocation7 + $0x8] sm:$0xff]   ;;  %v1151_v21 = vld [vmem:[#allocation5 + $0x70] ss:$8 sps:$4 sm:$0xff]   ;;  %p1679_p9 = scmp.ne.s32.totalorder %s1670_s24, 0 }
  0x85   : > { %365 = vmatprep.subr.bf16.mxu0 %v1134_v5  ;;  %982 = vmatpush3.bf16.msra.mxu1 %v1153_v15  ;;  %v1148_v19 = vld [vmem:[#allocation5 + $0x60] ss:$8 sps:$4 sm:$0xff]   ;;  %v1157_v23 = vld [vmem:[#allocation7 + $0x10] sm:$0xff]   ;;  %v1158_v24 = vld [vmem:[#allocation7 + $0x58] sm:$0xff]   ;;  %s823_s29 = smul.u32 (%p1679_p9), 20, %s1378_s16 }
  0x86   : > { %983 = vmatprep.subr.bf16.mxu1 %v1154_v16  ;;  %v235_v22 = vld [vmem:[%s1534_s30] sm:$0xff]  ;;  %v236_v25 = vld [vmem:[%s1534_s30 + $0x8] sm:$0xff]  ;;  %v1159_v26 = vld [vmem:[#allocation7 + $0x18] sm:$0xff]  }
  0x87   : > { %v1160_v27 = vld [vmem:[#allocation7 + $0x60] sm:$0xff]   ;;  %v255_v28 = vpack.c.bf16 %v236_v25, %v235_v22  ;;  %v1162_v30 = vld [vmem:[#allocation7 + $0x68] sm:$0xff]   ;;  %v237_v31 = vld [vmem:[%s1534_s30 + $0x10] sm:$0xff]  ;;  %s824_s8 = ssub.s32 (%p1679_p9), 38, %s823_s29 }
  0x88   : > { %366 = vmatpush1.bf16.msra.mxu0 %v1136_v6  ;;  %v1161_v29 = vld [vmem:[#allocation7 + $0x20] sm:$0xff]   ;;  %v238_v32 = vld [vmem:[%s1534_s30 + $0x18] sm:$0xff]  ;;  %v1163_v33 = vld [vmem:[#allocation7 + $0x28] sm:$0xff]   ;;  %p825_p10 = scmp.lt.s32.totalorder (%p1679_p9), %s824_s8, 20 }
  0x89   : > { %367 = vmatprep.subr.bf16.mxu0 %v1137_v7  ;;  %984 = vmatpush3.bf16.msra.mxu1 %v1155_v17  ;;  %v256_v34 = vpack.c.bf16 %v238_v32, %v237_v31  ;;  %v239_v35 = vld [vmem:[%s1534_s30 + $0x20] sm:$0xff]  ;;  %v240_v36 = vld [vmem:[%s1534_s30 + $0x28] sm:$0xff]  ;;  %v241_v38 = vld [vmem:[%s1534_s30 + $0x30] sm:$0xff] }
  0x8a   : > { %985 = vmatprep.subr.bf16.mxu1 %v1156_v18  ;;  %v257_v37 = vpack.c.bf16 %v240_v36, %v239_v35  ;;  %v242_v39 = vld [vmem:[%s1534_s30 + $0x38] sm:$0xff]  ;;  %v243_v41 = vld [vmem:[%s1534_s30 + $0x40] sm:$0xff]  ;;  %v244_v42 = vld [vmem:[%s1534_s30 + $0x48] sm:$0xff] }
  0x8b   : > { %v258_v40 = vpack.c.bf16 %v242_v39, %v241_v38  ;;  %v259_v43 = vpack.c.bf16 %v244_v42, %v243_v41  ;;  %v245_v44 = vld [vmem:[%s1534_s30 + $0x50] sm:$0xff]  ;;  %v246_v45 = vld [vmem:[%s1534_s30 + $0x58] sm:$0xff]  ;;  %v247_v47 = vld [vmem:[%s1534_s30 + $0x60] sm:$0xff] }
  0x8c   : > { %368 = vmatpush1.bf16.msra.mxu0 %v1139_v8  ;;  %v260_v46 = vpack.c.bf16 %v246_v45, %v245_v44  ;;  %v248_v48 = vld [vmem:[%s1534_s30 + $0x68] sm:$0xff]  ;;  %v249_v50 = vld [vmem:[%s1534_s30 + $0x70] sm:$0xff]  ;;  %v250_v51 = vld [vmem:[%s1534_s30 + $0x78] sm:$0xff] }
  0x8d   : > { %369 = vmatprep.subr.bf16.mxu0 %v1140_v9  ;;  %986 = vmatpush3.bf16.msra.mxu1 %v1157_v23  ;;  %v261_v49 = vpack.c.bf16 %v248_v48, %v247_v47  ;;  %v262_v52 = vpack.c.bf16 %v250_v51, %v249_v50  ;;  %v251_v53 = vld [vmem:[%s1534_s30 + $0x80] sm:$0xff]  ;;  %v252_v54 = vld [vmem:[%s1534_s30 + $0x88] sm:$0xff]  ;;  %v253_v56 = vld [vmem:[%s1534_s30 + $0x90] sm:$0xff] }
  0x8e   : > { %987 = vmatprep.subr.bf16.mxu1 %v1158_v24  ;;  %v263_v55 = vpack.c.bf16 %v252_v54, %v251_v53  ;;  %v254_v57 = vld [vmem:[%s1534_s30 + $0x98] sm:$0xff]  ;;  %v1164_v59 = vld [vmem:[#allocation7 + $0x70] sm:$0xff]  }
  0x8f   : > { %v264_v58 = vpack.c.bf16 %v254_v57, %v253_v56  ;;  %v1165_v60 = vld [vmem:[#allocation7 + $0x30] sm:$0xff]   ;;  %v1166_v61 = vld [vmem:[#allocation7 + $0x78] sm:$0xff]  }
  0x90   : > { %370 = vmatpush1.bf16.msra.mxu0 %v1142_v10  ;;  %v1167_v62 = vld [vmem:[#allocation7 + $0x38] sm:$0xff]  }
  0x91   : > { %371 = vmatprep.subr.bf16.mxu0 %v1143_v11  ;;  %988 = vmatpush3.bf16.msra.mxu1 %v1159_v26 }
  0x92   : > { %989 = vmatprep.subr.bf16.mxu1 %v1160_v27 }
  0x94   : > { %372 = vmatpush1.bf16.msra.mxu0 %v1145_v12 }
  0x95   : > { %373 = vmatprep.subr.bf16.mxu0 %v1146_v13  ;;  %990 = vmatpush3.bf16.msra.mxu1 %v1161_v29 }
  0x96   : > { %991 = vmatprep.subr.bf16.mxu1 %v1162_v30 }
  0x98   : > { %374 = vmatpush1.bf16.msra.mxu0 %v1148_v19 }
  0x99   : > { %375 = vmatprep.subr.bf16.mxu0 %v1149_v20  ;;  %992 = vmatpush3.bf16.msra.mxu1 %v1163_v33 }
  0x9a   : > { %993 = vmatprep.subr.bf16.mxu1 %v1164_v59 }
  0x9c   : > { %376 = vmatpush1.bf16.msra.mxu0 %v1151_v21 }
  0x9d   : > { %994 = vmatpush3.bf16.msra.mxu1 %v1165_v60 }
  0x9e   : > { %995 = vmatprep.subr.bf16.mxu1 %v1166_v61 }
  0x9f   : > { %394 = vmatmul.mubr.bf16.vlgmr.msra.gmra.mrb[0].mxu0 %v255_v28 }
  0xa0   : > { %403 = vmatprep.mubr.bf16.mxu0 %v1333_v0 }
  0xa1   : > { %996 = vmatpush3.bf16.msra.mxu1 %v1167_v62 }
  0xa7   : > { %404 = vmatmul.mubr.bf16.gmra.mrb[4].mxu0 %v256_v34 }
  0xa8   : > { %413 = vmatprep.mubr.bf16.mxu0 %v1333_v0 }
  0xaf   : > { %414 = vmatmul.mubr.bf16.gmra.mrb[8].mxu0 %v257_v37 }
  0xb0   : > { %423 = vmatprep.mubr.bf16.mxu0 %v1333_v0 }
  0xb7   : > { %424 = vmatmul.mubr.bf16.gmra.mrb[12].mxu0 %v258_v40 }
  0xb8   : > { %433 = vmatprep.mubr.bf16.mxu0 %v1333_v0 }
  0xbf   : > { %434 = vmatmul.mubr.bf16.gmra.mrb[16].mxu0 %v259_v43 }
  0xc0   : > { %443 = vmatprep.mubr.bf16.mxu0 %v1333_v0 }
  0xc7   : > { %444 = vmatmul.mubr.bf16.gmra.mrb[20].mxu0 %v260_v46 }
  0xc8   : > { %453 = vmatprep.mubr.bf16.mxu0 %v1333_v0 }
  0xcf   : > { %454 = vmatmul.mubr.bf16.gmra.mrb[24].mxu0 %v261_v49 }
  0xd0   : > { %463 = vmatprep.mubr.bf16.mxu0 %v1333_v0 }
  0xd7   : > { %464 = vmatmul.mubr.bf16.gmra.mrb[28].mxu0 %v262_v52 }
  0xd8   : > { %473 = vmatprep.mubr.bf16.mxu0 %v1333_v0 }
  0xdf   : > { %474 = vmatmul.mubr.bf16.gmra.mrb[32].mxu0 %v263_v55 }
  0xe0   : > { %483 = vmatprep.mubr.bf16.mxu0 %v1333_v0 }
  0xe7   : > { %484 = vmatmul.mubr.bf16.gmra.mrb[36].mxu0 %v264_v58 }
 0x172   : > { %v395_v63 = vpop.f32.mrb[0].mxu0 }
 0x173   : > { %v397_v1 = vpop.f32.mrb[1].mxu0  ;;  %v494_v3 = vmax.f32 %v395_v63, 0.0 }
 0x174   : > { %v399_v2 = vpop.f32.mrb[2].mxu0  ;;  %v495_v6 = vmax.f32 %v397_v1, 0.0 }
 0x175   : > { %v496_v4 = vmax.f32 %v399_v2, 0.0  ;;  %v401_v5 = vpop.f32.mrb[3].mxu0 }
 0x176   : > { %v497_v0 = vmax.f32 %v401_v5, 0.0 }
 0x177   : > { %v534_v7 = vpack.c.bf16 %v496_v4, %v494_v3 }
 0x178   : > { %v535_v8 = vpack.c.bf16 %v497_v0, %v495_v6 }
 0x17a   : > { %v405_v9 = vpop.f32.mrb[4].mxu0  ;;  %714 = vmatprep.mubr.bf16.mxu1 %v535_v8 }
 0x17b   : > { %v407_v10 = vpop.f32.mrb[5].mxu0  ;;  %715 = vmatmul.mubr.bf16.vlgmr.msra.gmra.mrb[0].mxu1 %v534_v7  ;;  %v498_v12 = vmax.f32 %v405_v9, 0.0 }
 0x17c   : > { %v409_v11 = vpop.f32.mrb[6].mxu0  ;;  %v499_v15 = vmax.f32 %v407_v10, 0.0 }
 0x17d   : > { %v500_v13 = vmax.f32 %v409_v11, 0.0  ;;  %v411_v14 = vpop.f32.mrb[7].mxu0 }
 0x17e   : > { %v501_v16 = vmax.f32 %v411_v14, 0.0 }
 0x17f   : > { %v536_v17 = vpack.c.bf16 %v500_v13, %v498_v12 }
 0x180   : > { %v537_v18 = vpack.c.bf16 %v501_v16, %v499_v15 }
 0x182   : > { %v415_v19 = vpop.f32.mrb[8].mxu0  ;;  %722 = vmatprep.mubr.bf16.mxu1 %v537_v18 }
 0x183   : > { %v417_v20 = vpop.f32.mrb[9].mxu0  ;;  %723 = vmatmul.mubr.bf16.gmra.mrb[4].mxu1 %v536_v17  ;;  %v502_v22 = vmax.f32 %v415_v19, 0.0 }
 0x184   : > { %v419_v21 = vpop.f32.mrb[10].mxu0  ;;  %v503_v25 = vmax.f32 %v417_v20, 0.0 }
 0x185   : > { %v504_v23 = vmax.f32 %v419_v21, 0.0  ;;  %v421_v24 = vpop.f32.mrb[11].mxu0 }
 0x186   : > { %v505_v26 = vmax.f32 %v421_v24, 0.0 }
 0x187   : > { %v538_v27 = vpack.c.bf16 %v504_v23, %v502_v22 }
 0x188   : > { %v539_v28 = vpack.c.bf16 %v505_v26, %v503_v25 }
 0x18a   : > { %v425_v29 = vpop.f32.mrb[12].mxu0  ;;  %730 = vmatprep.mubr.bf16.mxu1 %v539_v28 }
 0x18b   : > { %v427_v30 = vpop.f32.mrb[13].mxu0  ;;  %731 = vmatmul.mubr.bf16.gmra.mrb[8].mxu1 %v538_v27  ;;  %v506_v32 = vmax.f32 %v425_v29, 0.0 }
 0x18c   : > { %v429_v31 = vpop.f32.mrb[14].mxu0  ;;  %v507_v35 = vmax.f32 %v427_v30, 0.0 }
 0x18d   : > { %v508_v33 = vmax.f32 %v429_v31, 0.0  ;;  %v431_v34 = vpop.f32.mrb[15].mxu0 }
 0x18e   : > { %v509_v36 = vmax.f32 %v431_v34, 0.0 }
 0x18f   : > { %v540_v37 = vpack.c.bf16 %v508_v33, %v506_v32 }
 0x190   : > { %v541_v38 = vpack.c.bf16 %v509_v36, %v507_v35 }
 0x192   : > { %v435_v39 = vpop.f32.mrb[16].mxu0  ;;  %738 = vmatprep.mubr.bf16.mxu1 %v541_v38 }
 0x193   : > { %v437_v40 = vpop.f32.mrb[17].mxu0  ;;  %739 = vmatmul.mubr.bf16.gmra.mrb[12].mxu1 %v540_v37  ;;  %v510_v42 = vmax.f32 %v435_v39, 0.0 }
 0x194   : > { %v439_v41 = vpop.f32.mrb[18].mxu0  ;;  %v511_v45 = vmax.f32 %v437_v40, 0.0 }
 0x195   : > { %v512_v43 = vmax.f32 %v439_v41, 0.0  ;;  %v441_v44 = vpop.f32.mrb[19].mxu0 }
 0x196   : > { %v513_v46 = vmax.f32 %v441_v44, 0.0 }
 0x197   : > { %v542_v47 = vpack.c.bf16 %v512_v43, %v510_v42 }
 0x198   : > { %v543_v48 = vpack.c.bf16 %v513_v46, %v511_v45 }
 0x19a   : > { %v445_v49 = vpop.f32.mrb[20].mxu0  ;;  %746 = vmatprep.mubr.bf16.mxu1 %v543_v48 }
 0x19b   : > { %v447_v50 = vpop.f32.mrb[21].mxu0  ;;  %747 = vmatmul.mubr.bf16.gmra.mrb[16].mxu1 %v542_v47  ;;  %v514_v52 = vmax.f32 %v445_v49, 0.0 }
 0x19c   : > { %v449_v51 = vpop.f32.mrb[22].mxu0  ;;  %v515_v55 = vmax.f32 %v447_v50, 0.0 }
 0x19d   : > { %v516_v53 = vmax.f32 %v449_v51, 0.0  ;;  %v451_v54 = vpop.f32.mrb[23].mxu0 }
 0x19e   : > { %v517_v56 = vmax.f32 %v451_v54, 0.0 }
 0x19f   : > { %v544_v57 = vpack.c.bf16 %v516_v53, %v514_v52 }
 0x1a0   : > { %v545_v58 = vpack.c.bf16 %v517_v56, %v515_v55 }
 0x1a2   : > { %v455_v59 = vpop.f32.mrb[24].mxu0  ;;  %754 = vmatprep.mubr.bf16.mxu1 %v545_v58 }
 0x1a3   : > { %v457_v60 = vpop.f32.mrb[25].mxu0  ;;  %755 = vmatmul.mubr.bf16.gmra.mrb[20].mxu1 %v544_v57  ;;  %v518_v62 = vmax.f32 %v455_v59, 0.0 }
 0x1a4   : > { %v459_v61 = vpop.f32.mrb[26].mxu0  ;;  %v519_v2 = vmax.f32 %v457_v60, 0.0 }
 0x1a5   : > { %v520_v63 = vmax.f32 %v459_v61, 0.0  ;;  %v461_v1 = vpop.f32.mrb[27].mxu0 }
 0x1a6   : > { %v521_v3 = vmax.f32 %v461_v1, 0.0 }
 0x1a7   : > { %v546_v4 = vpack.c.bf16 %v520_v63, %v518_v62 }
 0x1a8   : > { %v547_v5 = vpack.c.bf16 %v521_v3, %v519_v2 }
 0x1aa   : > { %v465_v6 = vpop.f32.mrb[28].mxu0  ;;  %762 = vmatprep.mubr.bf16.mxu1 %v547_v5 }
 0x1ab   : > { %v467_v0 = vpop.f32.mrb[29].mxu0  ;;  %763 = vmatmul.mubr.bf16.gmra.mrb[24].mxu1 %v546_v4  ;;  %v522_v8 = vmax.f32 %v465_v6, 0.0 }
 0x1ac   : > { %v469_v7 = vpop.f32.mrb[30].mxu0  ;;  %v523_v11 = vmax.f32 %v467_v0, 0.0 }
 0x1ad   : > { %v524_v9 = vmax.f32 %v469_v7, 0.0  ;;  %v471_v10 = vpop.f32.mrb[31].mxu0 }
 0x1ae   : > { %v525_v12 = vmax.f32 %v471_v10, 0.0 }
 0x1af   : > { %v548_v13 = vpack.c.bf16 %v524_v9, %v522_v8 }
 0x1b0   : > { %v549_v14 = vpack.c.bf16 %v525_v12, %v523_v11 }
 0x1b2   : > { %v475_v15 = vpop.f32.mrb[32].mxu0  ;;  %770 = vmatprep.mubr.bf16.mxu1 %v549_v14 }
 0x1b3   : > { %v477_v16 = vpop.f32.mrb[33].mxu0  ;;  %771 = vmatmul.mubr.bf16.gmra.mrb[28].mxu1 %v548_v13  ;;  %v526_v18 = vmax.f32 %v475_v15, 0.0 }
 0x1b4   : > { %v479_v17 = vpop.f32.mrb[34].mxu0  ;;  %v527_v21 = vmax.f32 %v477_v16, 0.0 }
 0x1b5   : > { %v528_v19 = vmax.f32 %v479_v17, 0.0  ;;  %v481_v20 = vpop.f32.mrb[35].mxu0 }
 0x1b6   : > { %v529_v22 = vmax.f32 %v481_v20, 0.0 }
 0x1b7   : > { %v550_v23 = vpack.c.bf16 %v528_v19, %v526_v18 }
 0x1b8   : > { %v551_v24 = vpack.c.bf16 %v529_v22, %v527_v21 }
 0x1ba   : > { %v485_v25 = vpop.f32.mrb[36].mxu0  ;;  %778 = vmatprep.mubr.bf16.mxu1 %v551_v24 }
 0x1bb   : > { %v487_v26 = vpop.f32.mrb[37].mxu0  ;;  %779 = vmatmul.mubr.bf16.gmra.mrb[32].mxu1 %v550_v23  ;;  %v530_v28 = vmax.f32 %v485_v25, 0.0 }
 0x1bc   : > { %v489_v27 = vpop.f32.mrb[38].mxu0  ;;  %v531_v31 = vmax.f32 %v487_v26, 0.0 }
 0x1bd   : > { %v532_v29 = vmax.f32 %v489_v27, 0.0  ;;  %v491_v30 = vpop.f32.mrb[39].mxu0 }
 0x1be   : > { %v533_v32 = vmax.f32 %v491_v30, 0.0 }
 0x1bf   : > { %v552_v33 = vpack.c.bf16 %v532_v29, %v530_v28 }
 0x1c0   : > { %v553_v34 = vpack.c.bf16 %v533_v32, %v531_v31 }
 0x1c2   : > { %786 = vmatprep.mubr.bf16.mxu1 %v553_v34 }
 0x1c3   : > { %787 = vmatmul.mubr.bf16.gmra.mrb[36].mxu1 %v552_v33 }
 0x24e   : > { %v997_v35 = vpop.f32.mrb[0].mxu1 }
 0x24f   : > { %v998_v36 = vpop.f32.mrb[1].mxu1 }
 0x250   : > { %v999_v37 = vadd.f32 %v998_v36, %v997_v35  ;;  %v1000_v38 = vpop.f32.mrb[2].mxu1 }
 0x251   : > { %v1001_v39 = vpop.f32.mrb[3].mxu1 }
 0x252   : > { %795 = vst [vmem:[%s1576_s23] sm:$0xff] %v999_v37  ;;  %v1002_v40 = vadd.f32 %v1001_v39, %v1000_v38 }
 0x254   : > { %796 = vst [vmem:[%s1576_s23 + $0x8] sm:$0xff] %v1002_v40 }
 0x256   : > { %v1003_v41 = vpop.f32.mrb[4].mxu1 }
 0x257   : > { %v1004_v42 = vpop.f32.mrb[5].mxu1 }
 0x258   : > { %v1005_v43 = vadd.f32 %v1004_v42, %v1003_v41  ;;  %v1006_v44 = vpop.f32.mrb[6].mxu1 }
 0x259   : > { %v1007_v45 = vpop.f32.mrb[7].mxu1 }
 0x25a   : > { %797 = vst [vmem:[%s1576_s23 + $0x10] sm:$0xff] %v1005_v43  ;;  %v1008_v46 = vadd.f32 %v1007_v45, %v1006_v44 }
 0x25c   : > { %798 = vst [vmem:[%s1576_s23 + $0x18] sm:$0xff] %v1008_v46 }
 0x25e   : > { %v1009_v47 = vpop.f32.mrb[8].mxu1 }
 0x25f   : > { %v1010_v48 = vpop.f32.mrb[9].mxu1 }
 0x260   : > { %v1011_v49 = vadd.f32 %v1010_v48, %v1009_v47  ;;  %v1012_v50 = vpop.f32.mrb[10].mxu1 }
 0x261   : > { %v1013_v51 = vpop.f32.mrb[11].mxu1 }
 0x262   : > { %799 = vst [vmem:[%s1576_s23 + $0x20] sm:$0xff] %v1011_v49  ;;  %v1014_v52 = vadd.f32 %v1013_v51, %v1012_v50 }
 0x264   : > { %800 = vst [vmem:[%s1576_s23 + $0x28] sm:$0xff] %v1014_v52 }
 0x266   : > { %v1015_v53 = vpop.f32.mrb[12].mxu1 }
 0x267   : > { %v1016_v54 = vpop.f32.mrb[13].mxu1 }
 0x268   : > { %v1017_v55 = vadd.f32 %v1016_v54, %v1015_v53  ;;  %v1018_v56 = vpop.f32.mrb[14].mxu1 }
 0x269   : > { %v1019_v57 = vpop.f32.mrb[15].mxu1 }
 0x26a   : > { %801 = vst [vmem:[%s1576_s23 + $0x30] sm:$0xff] %v1017_v55  ;;  %v1020_v58 = vadd.f32 %v1019_v57, %v1018_v56 }
 0x26c   : > { %802 = vst [vmem:[%s1576_s23 + $0x38] sm:$0xff] %v1020_v58 }
 0x26e   : > { %v1021_v59 = vpop.f32.mrb[16].mxu1 }
 0x26f   : > { %v1022_v60 = vpop.f32.mrb[17].mxu1 }
 0x270   : > { %v1023_v61 = vadd.f32 %v1022_v60, %v1021_v59  ;;  %v1024_v62 = vpop.f32.mrb[18].mxu1 }
 0x271   : > { %v1025_v63 = vpop.f32.mrb[19].mxu1 }
 0x272   : > { %803 = vst [vmem:[%s1576_s23 + $0x40] sm:$0xff] %v1023_v61  ;;  %v1026_v1 = vadd.f32 %v1025_v63, %v1024_v62 }
 0x274   : > { %804 = vst [vmem:[%s1576_s23 + $0x48] sm:$0xff] %v1026_v1 }
 0x276   : > { %v1027_v2 = vpop.f32.mrb[20].mxu1 }
 0x277   : > { %v1028_v3 = vpop.f32.mrb[21].mxu1 }
 0x278   : > { %v1029_v4 = vadd.f32 %v1028_v3, %v1027_v2  ;;  %v1030_v5 = vpop.f32.mrb[22].mxu1 }
 0x279   : > { %v1031_v6 = vpop.f32.mrb[23].mxu1 }
 0x27a   : > { %805 = vst [vmem:[%s1576_s23 + $0x50] sm:$0xff] %v1029_v4  ;;  %v1032_v0 = vadd.f32 %v1031_v6, %v1030_v5 }
 0x27c   : > { %806 = vst [vmem:[%s1576_s23 + $0x58] sm:$0xff] %v1032_v0 }
 0x27e   : > { %v1033_v7 = vpop.f32.mrb[24].mxu1 }
 0x27f   : > { %v1034_v8 = vpop.f32.mrb[25].mxu1 }
 0x280   : > { %v1035_v9 = vadd.f32 %v1034_v8, %v1033_v7  ;;  %v1036_v10 = vpop.f32.mrb[26].mxu1 }
 0x281   : > { %v1037_v11 = vpop.f32.mrb[27].mxu1 }
 0x282   : > { %807 = vst [vmem:[%s1576_s23 + $0x60] sm:$0xff] %v1035_v9  ;;  %v1038_v12 = vadd.f32 %v1037_v11, %v1036_v10 }
 0x284   : > { %808 = vst [vmem:[%s1576_s23 + $0x68] sm:$0xff] %v1038_v12 }
 0x286   : > { %v1039_v13 = vpop.f32.mrb[28].mxu1 }
 0x287   : > { %v1040_v14 = vpop.f32.mrb[29].mxu1 }
 0x288   : > { %v1041_v15 = vadd.f32 %v1040_v14, %v1039_v13  ;;  %v1042_v16 = vpop.f32.mrb[30].mxu1 }
 0x289   : > { %v1043_v17 = vpop.f32.mrb[31].mxu1 }
 0x28a   : > { %809 = vst [vmem:[%s1576_s23 + $0x70] sm:$0xff] %v1041_v15  ;;  %v1044_v18 = vadd.f32 %v1043_v17, %v1042_v16 }
 0x28c   : > { %810 = vst [vmem:[%s1576_s23 + $0x78] sm:$0xff] %v1044_v18 }
 0x28e   : > { %v1045_v19 = vpop.f32.mrb[32].mxu1 }
 0x28f   : > { %v1046_v20 = vpop.f32.mrb[33].mxu1 }
 0x290   : > { %v1047_v21 = vadd.f32 %v1046_v20, %v1045_v19  ;;  %v1048_v22 = vpop.f32.mrb[34].mxu1 }
 0x291   : > { %v1049_v23 = vpop.f32.mrb[35].mxu1 }
 0x292   : > { %811 = vst [vmem:[%s1576_s23 + $0x80] sm:$0xff] %v1047_v21  ;;  %v1050_v24 = vadd.f32 %v1049_v23, %v1048_v22 }
 0x294   : > { %812 = vst [vmem:[%s1576_s23 + $0x88] sm:$0xff] %v1050_v24 }
 0x296   : > { %v1051_v25 = vpop.f32.mrb[36].mxu1  ;;  %822 = sbr.rel (!%p1679_p9) target bundleno = 697 (0x2b9), region = 48 }
 0x297   : > { %v1052_v26 = vpop.f32.mrb[37].mxu1 }
 0x298   : > { %v1053_v27 = vadd.f32 %v1052_v26, %v1051_v25  ;;  %v1054_v28 = vpop.f32.mrb[38].mxu1 }
 0x299   : > { %v1055_v29 = vpop.f32.mrb[39].mxu1 }
 0x29a   : > { %813 = vst [vmem:[%s1576_s23 + $0x90] sm:$0xff] %v1053_v27  ;;  %v1056_v30 = vadd.f32 %v1055_v29, %v1054_v28 }
 0x29c   : > { %814 = vst [vmem:[%s1576_s23 + $0x98] sm:$0xff] %v1056_v30 }
 0x29d   : > { %s1688_s8 = smov (!%p825_p10, %s824_s8), 20 }
 0x29e   : > { %s1602_s10 = sshll.u32 %s1688_s8, 7 }
 0x29f   : > { %s829_s17 = ssub.s32 2560, %s1602_s10 }
 0x2a0   : > { %830 = vsyncadd %s816_s26, %s829_s17  ;;  %p973_p1 = scmp.ne.s32.totalorder %s1602_s10, 0  ;;  %s980_s24 = smul.u32 2560, %s1378_s16 }
 0x2a1   : > { %s835_s5 = sshll.u32 %s1576_s23, 4  ;;  %s1334_s22 = smov [#allocation8]   ;;  %s1615_s5 = int_to_ptr.vmem [resolvable:$true] %s835_s5 }
 0x2a2   : > { %s1613_s4 = scalar_lea.hbm %s1664_s3, %s980_s24  ;;  %s1252_s9 = scalar_lea.vmem %s1615_s5, %s1602_s10 }
 0x2a3   : > { %p1253_p3 = scmp.ne.s32.totalorder %s1615_s5, %s1252_s9  ;;  %s1256_s11 = sshll.u32 %s1334_s22, 4  ;;  %s1257_s11 = int_to_ptr.vmem [resolvable:$false] %s1256_s11 }
 0x2a4   : > { %s1258_s16 = scalar_lea.vmem %s1257_s11, 5120  ;;  %p1259_p11 = scmp.lt.s32.totalorder %s1615_s5, %s1257_s11 }
 0x2a5   : > { %p1254_p5 = pnand %p1253_p3, %p973_p1  ;;  %p1260_p13 = scmp.lt.s32.totalorder %s1258_s16, %s1252_s9 }
 0x2a7   : > { %p1255_p6 = pneg %p1254_p5  ;;  %p1261_p0 = por %p1260_p13, %p1259_p11 }
 0x2a9   : > { %p1262_p12 = pnand %p1261_p0, %p1255_p6 }
 0x2ab   : > { %1265 = shalt.err (!%p1262_p12)
}
 0x2ac   : > { %s1266_s28 = scalar_lea.hbm %s1613_s4, %s1602_s10  ;;  %s1270_s30 = scalar_lea.hbm %s1664_s3, 4864 }
 0x2ad   : > { %p1267_p7 = scmp.ne.s32.totalorder %s1613_s4, %s1266_s28  ;;  %p1271_p9 = scmp.lt.u32.totalorder %s1613_s4, %s1664_s3 }
 0x2ae   : > { %p1272_p10 = scmp.lt.u32.totalorder %s1270_s30, %s1266_s28  ;;  %p1274_p5 = scmp.lt.u32.totalorder %s1266_s28, %s1613_s4 }
 0x2af   : > { %p1268_p2 = pnand %p1267_p7, %p973_p1 }
 0x2b0   : > { %p1273_p3 = por %p1272_p10, %p1271_p9 }
 0x2b1   : > { %p1269_p8 = pneg %p1268_p2 }
 0x2b2   : > { %p1275_p6 = por %p1274_p5, %p1273_p3 }
 0x2b4   : > { %p1276_p11 = pnand %p1275_p6, %p1269_p8 }
 0x2b6   : > { %1279 = shalt.err (!%p1276_p11)
}
 0x2b7   : > { %s1335_s8 = smov 128   ;;  %s1336_s17 = smov 8  }
 0x2b8   : > { %841 = dma.vmem_to_hbm [thread:$0]  (%p973_p1), %s1615_s5, %s1602_s10, %s1613_s4, %s816_s26, %s1335_s8, %s1335_s8, %s1336_s17  }
 0x2b9 PF: > { %s850_s24 = sand.u32 1, %s1310_s12   ;;  %p1680_p13 = scmp.ne.s32.totalorder %s1671_s25, 0 }
 0x2ba   : > { %s851_s6 = scalar_lea.sflag [#allocation4], %s850_s24 }
 0x2bb   : > { %p1077_p0 = pnand %p931_p4, %p1680_p13 }
 0x2bd   : > { %1305 = dma.done.wait (!%p1077_p0), %s851_s6, 2560  }
 0x2be   : > { %1307 = vsyncadd (!%p1077_p0), %s851_s6, 4294964736  ;;  %p17_p12 = scmp.ge.s32.totalorder %s1382_s18, 4   ;;  %s1681_s12 = smov %s1314_s13 }
 0x2bf   : > { %s1682_s13 = smov %s1318_s14  ;;  %s1683_s14 = smov %s1394_s21 }
 0x2c0   : > { %s1684_s15 = smov %s1382_s18  ;;  %19 = sbr.rel (!%p17_p12) target bundleno = 6 (0x6), region = 85 }
 0x2c7   :  { %856 = vsyncpa [#allocation3], 1 }
 0x2c8   :  { %858 = vsyncpa [#allocation3 + $0x1], 1 }
 0x2c9   :  { %859 = vsyncpa [#allocation6], 1 }
 0x2ca   :  { %860 = vsyncpa [#allocation4], 1 }
 0x2cb   :  { %862 = vsyncpa [#allocation4 + $0x1], 1 }

</bundles_post_ra>
